<compile_context>
chip_gen: v6e
topology: v6e:2x2x1
jax: 0.10.0
libtpu: 0.0.40
codegen_flags: <defaults>
</compile_context>

<pallas_src>
import jax
import jax.numpy as jnp
from jax import lax
from jax.experimental import pallas as pl
from jax.experimental.pallas import tpu as pltpu


# ----------------------------------------------------------------------------
# Helpers
# ----------------------------------------------------------------------------
def _nbytes(shape, dtype):
    n = 1
    for s in shape:
        n *= int(s)
    return n * jnp.dtype(dtype).itemsize


def _vmem_limit_bytes(block_bytes):
    """Double-buffered block footprint + headroom, clamped to sane bounds."""
    need = 2 * sum(block_bytes) + (8 << 20)
    return int(min(max(need, 16 << 20), 96 << 20))


# ----------------------------------------------------------------------------
# Standalone InputAttention forward (the spec module, single time step).
# ----------------------------------------------------------------------------
def input_attention_kernel(xpart_ref,  # (Bb, n, T)  hoisted X @ W1x.T
                           xt_ref,     # (Bb, n)     X[:, :, time_step]
                           h_ref,      # (Bb, m)     encoder hidden state
                           c_ref,      # (Bb, m)     encoder cell state
                           w1hc_ref,   # (2m, T)     FC1 weight on [h, c]
                           b1_ref,     # (1, T)
                           w2_ref,     # (1, T)      FC2 weight
                           out_ref):   # (Bb, n)     X_tild
    hc = jnp.concatenate([h_ref[...], c_ref[...]], axis=-1)          # (Bb, 2m)
    hc = hc.astype(w1hc_ref.dtype)
    hc_part = (jnp.dot(hc, w1hc_ref[...],
                       preferred_element_type=jnp.float32)
               + b1_ref[...])                                         # (Bb, T)
    z = jnp.tanh(xpart_ref[...] + hc_part[:, None, :])               # (Bb, n, T)
    e = jnp.sum(z * w2_ref[...], axis=-1)                            # (Bb, n)
    # FC2 bias is uniform over the softmax (n) axis -> cancels; omitted.
    # z is tanh-bounded so |e| <= T*max|w2|: exp cannot overflow and the usual
    # max-subtraction is dropped (perf-review sanctioned).
    p = jnp.exp(e)
    alpha = p * pl.reciprocal(jnp.sum(p, axis=1, keepdims=True), approx=True)
    out_ref[...] = (alpha * xt_ref[...]).astype(out_ref.dtype)


def input_attention(X, h, c, time_step, params, *, num_batch_blocks=1,
                    operand_dtype=jnp.float32):
    """Exact InputAttention.forward: (B,n,T),(B,m),(B,m),int -> (B,n)."""
    B, n, T = X.shape
    m = h.shape[1]
    nb = num_batch_blocks
    assert B % nb == 0, "batch must be divisible by num_batch_blocks"
    Bb = B // nb
    if nb > 1:
        assert Bb % 8 == 0, "per-block batch must be a multiple of 8"

    w1 = params["fc1_w"]                                     # (T, 2m + T)
    w1hc_t = jnp.transpose(w1[:, :2 * m]).astype(operand_dtype)   # (2m, T)
    w1x = w1[:, 2 * m:]                                      # (T, T)
    b1 = params["fc1_b"].reshape(1, T).astype(jnp.float32)
    w2 = params["fc2_w"].reshape(1, T).astype(jnp.float32)
    # Grid-invariant FC1 term on X, hoisted out of the kernel; einsum (not a
    # reshape to (B*n, T)) so no tile-boundary-crossing copy is needed.
    x_part = jnp.einsum("bnt,st->bns", X, w1x).astype(operand_dtype)  # (B,n,T)
    x_t = X[:, :, int(time_step)].astype(operand_dtype)               # (B, n)

    vmem = _vmem_limit_bytes([
        _nbytes((Bb, n, T), operand_dtype), _nbytes((Bb, n), operand_dtype),
        _nbytes((Bb, m), jnp.float32), _nbytes((Bb, m), jnp.float32),
        _nbytes((2 * m, T), operand_dtype), _nbytes((1, T), jnp.float32),
        _nbytes((1, T), jnp.float32), _nbytes((Bb, n), jnp.float32),
    ])

    return pl.pallas_call(
        input_attention_kernel,
        out_shape=jax.ShapeDtypeStruct((B, n), jnp.float32),
        grid=(nb,),
        in_specs=[
            pl.BlockSpec((Bb, n, T), lambda b: (b, 0, 0)),
            pl.BlockSpec((Bb, n), lambda b: (b, 0)),
            pl.BlockSpec((Bb, m), lambda b: (b, 0)),
            pl.BlockSpec((Bb, m), lambda b: (b, 0)),
            pl.BlockSpec((2 * m, T), lambda b: (0, 0)),
            pl.BlockSpec((1, T), lambda b: (0, 0)),
            pl.BlockSpec((1, T), lambda b: (0, 0)),
        ],
        out_specs=pl.BlockSpec((Bb, n), lambda b: (b, 0)),
        compiler_params=pltpu.CompilerParams(
            dimension_semantics=("parallel",),
            vmem_limit_bytes=vmem,
        ),
    )(x_part, x_t, h.astype(jnp.float32), c.astype(jnp.float32),
      w1hc_t, b1, w2)


# ----------------------------------------------------------------------------
# DA-RNN encoder recurrence (InputAttention + LSTMCell per time step).
# ----------------------------------------------------------------------------
def encoder_lstm_kernel(xt_ref,     # (T, Bb, n)  X[:, :, t] slabs
                        xpart_ref,  # (Bb, n, T)  hoisted X @ W1x.T
                        w1hc_ref,   # (2m, T)     FC1 weight on [h, c]
                        b1_ref,     # (1, T)
                        w2_ref,     # (1, T)      FC2 weight
                        wg_ref,     # (n+m, 4m)   fused gate weights [i|f|g|o]
                        bg_ref,     # (1, 4m)     fused gate biases
                        out_ref,    # (Bb, T*m)   hidden states, lane-dense
                        hs_ref):    # (T, Bb, m)  VMEM staging for hidden states
    T, Bb, n = xt_ref.shape
    m = hs_ref.shape[2]

    def step(t, carry):
        h, c = carry                                              # (Bb, m) f32

        # -------- InputAttention --------
        # Invariants are re-read from refs each step (regalloc decides what
        # stays resident; no forced whole-loop live ranges -> no spill regime
        # as B*n*T grows).
        hc = jnp.concatenate([h, c], axis=-1).astype(w1hc_ref.dtype)  # (Bb,2m)
        hc_part = (jnp.dot(hc, w1hc_ref[...],
                           preferred_element_type=jnp.float32)
                   + b1_ref[...])                                  # (Bb, T)
        z = jnp.tanh(xpart_ref[...] + hc_part[:, None, :])        # (Bb, n, T)
        e = jnp.sum(z * w2_ref[...], axis=-1)                     # (Bb, n)
        # FC2 bias cancels in the softmax; z is tanh-bounded so exp(e) cannot
        # overflow -> max-subtraction dropped from the serial critical path.
        p = jnp.exp(e)
        alpha = p * pl.reciprocal(jnp.sum(p, axis=1, keepdims=True),
                                  approx=True)                    # (Bb, n)
        x_tild = alpha * xt_ref[t]                                # (Bb, n)

        # -------- LSTMCell: one fused (Bb, n+m) @ (n+m, 4m) gate matmul -----
        xh = jnp.concatenate([x_tild, h], axis=-1).astype(wg_ref.dtype)
        gates = (jnp.dot(xh, wg_ref[...],
                         preferred_element_type=jnp.float32)
                 + bg_ref[...])                                   # (Bb, 4m)
        i_g = jax.nn.sigmoid(gates[:, 0 * m:1 * m])               # PyTorch order
        f_g = jax.nn.sigmoid(gates[:, 1 * m:2 * m])               # i, f, g, o
        g_g = jnp.tanh(gates[:, 2 * m:3 * m])
        o_g = jax.nn.sigmoid(gates[:, 3 * m:4 * m])
        c_new = f_g * c + i_g * g_g
        h_new = o_g * jnp.tanh(c_new)

        hs_ref[t] = h_new                                         # stage h_t
        return h_new, c_new

    h0 = jnp.zeros((Bb, m), jnp.float32)
    c0 = jnp.zeros((Bb, m), jnp.float32)
    unroll = True if T <= 16 else 8    # cap unroll for long windows
    _ = lax.fori_loop(0, T, step, (h0, c0), unroll=unroll)

    # Single lane-dense flush (T*m lanes, unmasked store) instead of T
    # strided masked per-step output stores.
    out_ref[...] = jnp.concatenate([hs_ref[tt] for tt in range(T)], axis=-1)


def encoder_lstm(X, params, *, num_batch_blocks=1, operand_dtype=jnp.float32):
    """X: (B, n, T) float32 -> hidden states (B, T, m) float32.

    operand_dtype=jnp.bfloat16 stores the MXU operands / big inputs in bf16
    (v6e/v7x suggestion); accumulation and elementwise math stay f32.
    num_batch_blocks=2 splits the batch across v7x's two TensorCores.
    """
    B, n, T = X.shape
    m = params["whh"].shape[1]

    nb = num_batch_blocks
    assert B % nb == 0, "batch must be divisible by num_batch_blocks"
    Bb = B // nb
    if nb > 1:
        # x_tbn's batch axis is a sublane axis; blocks must stay (8,.)-tiled.
        assert Bb % 8 == 0, "per-core batch block must be a multiple of 8"

    # ---- one-time weight preparation (plain XLA, outside the kernel) ----
    w1 = params["fc1_w"]                                    # (T, 2m + T)
    w1hc_t = jnp.transpose(w1[:, :2 * m]).astype(operand_dtype)   # (2m, T)
    w1x = w1[:, 2 * m:]                                     # (T, T)
    b1 = params["fc1_b"].reshape(1, T).astype(jnp.float32)
    w2 = params["fc2_w"].reshape(1, T).astype(jnp.float32)
    # params["fc2_b"] cancels in the softmax; intentionally not passed.

    # Fused LSTM gate weights: (n+m, 4m), gate blocks i|f|g|o along lanes, so
    # one MXU dot per step yields the full 4m-lane gate row; biases pre-summed.
    wg = jnp.transpose(
        jnp.concatenate([params["wih"], params["whh"]], axis=1)
    ).astype(operand_dtype)                                 # (n+m, 4m)
    bg = (params["bih"] + params["bhh"]).reshape(1, 4 * m).astype(jnp.float32)

    # Loop-invariant FC1 term, hoisted out of the recurrence.
    x_part = jnp.einsum("bnt,st->bns", X, w1x).astype(operand_dtype)  # (B,n,T)
    x_tbn = jnp.transpose(X, (2, 0, 1)).astype(operand_dtype)         # (T,B,n)

    vmem = _vmem_limit_bytes([
        _nbytes((T, Bb, n), operand_dtype), _nbytes((Bb, n, T), operand_dtype),
        _nbytes((2 * m, T), operand_dtype), _nbytes((1, T), jnp.float32),
        _nbytes((1, T), jnp.float32), _nbytes((n + m, 4 * m), operand_dtype),
        _nbytes((1, 4 * m), jnp.float32), _nbytes((Bb, T * m), jnp.float32),
        _nbytes((T, Bb, m), jnp.float32),
    ])

    out = pl.pallas_call(
        encoder_lstm_kernel,
        out_shape=jax.ShapeDtypeStruct((B, T * m), jnp.float32),
        grid=(nb,),
        in_specs=[
            pl.BlockSpec((T, Bb, n), lambda b: (0, b, 0)),   # X[:, :, t] slabs
            pl.BlockSpec((Bb, n, T), lambda b: (b, 0, 0)),   # hoisted X @ W1x.T
            pl.BlockSpec((2 * m, T), lambda b: (0, 0)),
            pl.BlockSpec((1, T), lambda b: (0, 0)),
            pl.BlockSpec((1, T), lambda b: (0, 0)),
            pl.BlockSpec((n + m, 4 * m), lambda b: (0, 0)),
            pl.BlockSpec((1, 4 * m), lambda b: (0, 0)),
        ],
        out_specs=pl.BlockSpec((Bb, T * m), lambda b: (b, 0)),
        scratch_shapes=[pltpu.VMEM((T, Bb, m), jnp.float32)],
        compiler_params=pltpu.CompilerParams(
            # Independent per-batch recurrences -> "parallel" (lets v7x's two
            # TensorCores split the batch when num_batch_blocks > 1).
            dimension_semantics=("parallel",),
            vmem_limit_bytes=vmem,
        ),
    )(x_tbn, x_part, w1hc_t, b1, w2, wg, bg)
    # Free metadata reshape into the (B, T, m) layout callers expect.
    return out.reshape(B, T, m)


# ----------------------------------------------------------------------------
# Pure-JAX references mirroring the PyTorch forward passes.
# ----------------------------------------------------------------------------
def input_attention_ref(X, h, c, time_step, params):
    B, n, T = X.shape
    m = h.shape[1]
    hexp = jnp.broadcast_to(h[:, None, :], (B, n, m))
    cexp = jnp.broadcast_to(c[:, None, :], (B, n, m))
    concat = jnp.concatenate([hexp, cexp, X], axis=2)                 # (B,n,2m+T)
    z = jnp.tanh(concat @ params["fc1_w"].T + params["fc1_b"])        # (B,n,T)
    z = z @ params["fc2_w"].T + params["fc2_b"]                       # (B,n,1)
    alpha = jax.nn.softmax(z, axis=1)[..., 0]                         # (B,n)
    return alpha * X[:, :, time_step]


def encoder_lstm_ref(X, params):
    B, n, T = X.shape
    m = params["whh"].shape[1]
    h = jnp.zeros((B, m), jnp.float32)
    c = jnp.zeros((B, m), jnp.float32)
    hs = []
    for t in range(T):
        x_tild = input_attention_ref(X, h, c, t, params)
        gates = (x_tild @ params["wih"].T + params["bih"]
                 + h @ params["whh"].T + params["bhh"])
        i = jax.nn.sigmoid(gates[:, :m])
        f = jax.nn.sigmoid(gates[:, m:2 * m])
        g = jnp.tanh(gates[:, 2 * m:3 * m])
        o = jax.nn.sigmoid(gates[:, 3 * m:])
        c = f * c + i * g
        h = o * jnp.tanh(c)
        hs.append(h)
    return jnp.stack(hs, axis=1)                                      # (B, T, m)


if __name__ == "__main__":
    B, n, T, m = 2, 8, 8, 32

    key = jax.random.PRNGKey(0)
    ks = jax.random.split(key, 11)

    def unif(k, shape, fan_in):
        bound = float(fan_in) ** -0.5
        return jax.random.uniform(k, shape, jnp.float32, -bound, bound)

    params = {
        "fc1_w": unif(ks[0], (T, 2 * m + T), 2 * m + T),
        "fc1_b": unif(ks[1], (T,), 2 * m + T),
        "fc2_w": unif(ks[2], (1, T), T),
        "fc2_b": unif(ks[3], (1,), T),
        "wih":   unif(ks[4], (4 * m, n), m),
        "whh":   unif(ks[5], (4 * m, m), m),
        "bih":   unif(ks[6], (4 * m,), m),
        "bhh":   unif(ks[7], (4 * m,), m),
    }
    X = jax.random.normal(ks[8], (B, n, T), jnp.float32)
    h0 = 0.1 * jax.random.normal(ks[9], (B, m), jnp.float32)
    c0 = 0.1 * jax.random.normal(ks[10], (B, m), jnp.float32)

    # Tolerance 2e-3: pl.reciprocal(approx=True) in the softmax normalisation
    # introduces ~1e-3 relative error (documented, perf-review sanctioned).
    RTOL = ATOL = 2e-3

    # 1) Standalone InputAttention forward (the spec module), time_step = 3.
    attn = jax.block_until_ready(input_attention(X, h0, c0, 3, params))
    attn_ref = jax.block_until_ready(input_attention_ref(X, h0, c0, 3, params))
    assert attn.shape == (B, n), attn.shape
    assert jnp.allclose(attn, attn_ref, rtol=RTOL, atol=ATOL), float(
        jnp.max(jnp.abs(attn - attn_ref)))

    # 2) Full DA-RNN encoder recurrence using InputAttention at every step.
    out = jax.block_until_ready(encoder_lstm(X, params))
    ref = jax.block_until_ready(encoder_lstm_ref(X, params))
    assert out.shape == (B, T, m), out.shape
    assert jnp.allclose(out, ref, rtol=RTOL, atol=ATOL), float(
        jnp.max(jnp.abs(out - ref)))

    # 3) bf16 MXU-operand storage (v6e/v7x path); f32 accumulation and f32
    #    elementwise math, so only operand rounding error -> loose sanity
    #    tolerance over the 8-step recurrence.
    out_bf = jax.block_until_ready(
        encoder_lstm(X, params, operand_dtype=jnp.bfloat16))
    assert out_bf.shape == (B, T, m), out_bf.shape
    assert jnp.allclose(out_bf, ref, rtol=1e-1, atol=1e-1), float(
        jnp.max(jnp.abs(out_bf - ref)))

    # TODO(synk): for v7x, call encoder_lstm(..., num_batch_blocks=2) once the
    # real batch satisfies (B/2) % 8 == 0 so both TensorCores are used.
    print("KERNEL_OK")
</pallas_src>

<mosaic_0001>
module attributes {stable_mosaic.version = 11 : i64} {
  func.func @input_attention_kernel(%arg0: i32, %arg1: memref<2x8x8xf32, #tpu.memory_space<vmem>>, %arg2: memref<2x8xf32, #tpu.memory_space<vmem>>, %arg3: memref<2x32xf32, #tpu.memory_space<vmem>>, %arg4: memref<2x32xf32, #tpu.memory_space<vmem>>, %arg5: memref<64x8xf32, #tpu.memory_space<vmem>>, %arg6: memref<1x8xf32, #tpu.memory_space<vmem>>, %arg7: memref<1x8xf32, #tpu.memory_space<vmem>>, %arg8: memref<2x8xf32, #tpu.memory_space<vmem>>) attributes {dimension_semantics = [#tpu.dimension_semantics<parallel>], iteration_bounds = array<i64: 1>, scalar_prefetch = 0 : i64, scratch_operands = 0 : i64, tpu.core_type = #tpu.core_type<tc>, window_params = [{transform_indices = @transform_0, window_bounds = array<i64: 2, 8, 8>}, {transform_indices = @transform_1, window_bounds = array<i64: 2, 8>}, {transform_indices = @transform_2, window_bounds = array<i64: 2, 32>}, {transform_indices = @transform_3, window_bounds = array<i64: 2, 32>}, {pipeline_mode = #tpu.pipeline_mode<synchronous>, transform_indices = @transform_4, window_bounds = array<i64: 64, 8>}, {pipeline_mode = #tpu.pipeline_mode<synchronous>, transform_indices = @transform_5, window_bounds = array<i64: 1, 8>}, {pipeline_mode = #tpu.pipeline_mode<synchronous>, transform_indices = @transform_6, window_bounds = array<i64: 1, 8>}, {transform_indices = @transform_7, window_bounds = array<i64: 2, 8>}]} {
    %c0 = arith.constant 0 : index
    %c0_0 = arith.constant 0 : index
    %0 = vector.load %arg3[%c0, %c0_0] : memref<2x32xf32, #tpu.memory_space<vmem>>, vector<2x32xf32>
    %c0_1 = arith.constant 0 : index
    %c0_2 = arith.constant 0 : index
    %1 = vector.load %arg4[%c0_1, %c0_2] : memref<2x32xf32, #tpu.memory_space<vmem>>, vector<2x32xf32>
    %2 = tpu.concatenate %0, %1 in 1 : vector<2x32xf32>, vector<2x32xf32> -> vector<2x64xf32>
    %c0_3 = arith.constant 0 : index
    %c0_4 = arith.constant 0 : index
    %3 = vector.load %arg5[%c0_3, %c0_4] : memref<64x8xf32, #tpu.memory_space<vmem>>, vector<64x8xf32>
    %cst = arith.constant dense<0.000000e+00> : vector<2x8xf32>
    %4 = tpu.matmul %2, %3, %cst {dimension_numbers = #tpu.dot_dimension_numbers<[1], [0], [0], [1], [0, 0, 1, 1], [], []>} : vector<2x64xf32>, vector<64x8xf32>, vector<2x8xf32> -> vector<2x8xf32>
    %c0_5 = arith.constant 0 : index
    %c0_6 = arith.constant 0 : index
    %5 = vector.load %arg6[%c0_5, %c0_6] : memref<1x8xf32, #tpu.memory_space<vmem>>, vector<1x8xf32>
    %6 = vector.broadcast %5 : vector<1x8xf32> to vector<2x8xf32>
    %7 = arith.addf %4, %6 : vector<2x8xf32>
    %c0_7 = arith.constant 0 : index
    %c0_8 = arith.constant 0 : index
    %c0_9 = arith.constant 0 : index
    %8 = vector.load %arg1[%c0_7, %c0_8, %c0_9] : memref<2x8x8xf32, #tpu.memory_space<vmem>>, vector<2x8x8xf32>
    %9 = vector.shape_cast %7 : vector<2x8xf32> to vector<2x1x8xf32>
    %10 = vector.broadcast %9 : vector<2x1x8xf32> to vector<2x8x8xf32>
    %11 = arith.addf %8, %10 : vector<2x8x8xf32>
    %12 = math.tanh %11 : vector<2x8x8xf32>
    %c0_10 = arith.constant 0 : index
    %c0_11 = arith.constant 0 : index
    %13 = vector.load %arg7[%c0_10, %c0_11] : memref<1x8xf32, #tpu.memory_space<vmem>>, vector<1x8xf32>
    %14 = vector.shape_cast %13 : vector<1x8xf32> to vector<1x1x8xf32>
    %15 = vector.broadcast %14 : vector<1x1x8xf32> to vector<2x8x8xf32>
    %16 = arith.mulf %12, %15 : vector<2x8x8xf32>
    %cst_12 = arith.constant dense<0.000000e+00> : vector<2x8xf32>
    %17 = vector.multi_reduction <add>, %16, %cst_12 [2] : vector<2x8x8xf32> to vector<2x8xf32>
    %18 = math.exp %17 : vector<2x8xf32>
    %cst_13 = arith.constant dense<0.000000e+00> : vector<2xf32>
    %19 = vector.multi_reduction <add>, %18, %cst_13 [1] : vector<2x8xf32> to vector<2xf32>
    %20 = vector.shape_cast %19 : vector<2xf32> to vector<2x1xf32>
    %21 = tpu.reciprocal %20 {approx = true} : vector<2x1xf32> -> vector<2x1xf32>
    %22 = vector.broadcast %21 : vector<2x1xf32> to vector<2x8xf32>
    %23 = arith.mulf %18, %22 : vector<2x8xf32>
    %c0_14 = arith.constant 0 : index
    %c0_15 = arith.constant 0 : index
    %24 = vector.load %arg2[%c0_14, %c0_15] : memref<2x8xf32, #tpu.memory_space<vmem>>, vector<2x8xf32>
    %25 = arith.mulf %23, %24 : vector<2x8xf32>
    %c0_16 = arith.constant 0 : index
    %c0_17 = arith.constant 0 : index
    %26 = vector.load %arg8[%c0_16, %c0_17] : memref<2x8xf32, #tpu.memory_space<vmem>>, vector<2x8xf32>
    tpu.vector_store %arg8[%c0_16, %c0_17], %25 {strides = array<i32>} : memref<2x8xf32, #tpu.memory_space<vmem>>, vector<2x8xf32>,
    return
  }
  func.func @transform_0(%arg0: i32) -> (i32, i32, i32) {
    %c0_i32 = arith.constant 0 : i32
    %c0_i32_0 = arith.constant 0 : i32
    %c0_i32_1 = arith.constant 0 : i32
    return %arg0, %c0_i32, %c0_i32_0 : i32, i32, i32
  }
  func.func @transform_1(%arg0: i32) -> (i32, i32) {
    %c0_i32 = arith.constant 0 : i32
    %c0_i32_0 = arith.constant 0 : i32
    return %arg0, %c0_i32 : i32, i32
  }
  func.func @transform_2(%arg0: i32) -> (i32, i32) {
    %c0_i32 = arith.constant 0 : i32
    %c0_i32_0 = arith.constant 0 : i32
    return %arg0, %c0_i32 : i32, i32
  }
  func.func @transform_3(%arg0: i32) -> (i32, i32) {
    %c0_i32 = arith.constant 0 : i32
    %c0_i32_0 = arith.constant 0 : i32
    return %arg0, %c0_i32 : i32, i32
  }
  func.func @transform_4(%arg0: i32) -> (i32, i32) {
    %c0_i32 = arith.constant 0 : i32
    %c0_i32_0 = arith.constant 0 : i32
    %c0_i32_1 = arith.constant 0 : i32
    return %c0_i32, %c0_i32_0 : i32, i32
  }
  func.func @transform_5(%arg0: i32) -> (i32, i32) {
    %c0_i32 = arith.constant 0 : i32
    %c0_i32_0 = arith.constant 0 : i32
    %c0_i32_1 = arith.constant 0 : i32
    return %c0_i32, %c0_i32_0 : i32, i32
  }
  func.func @transform_6(%arg0: i32) -> (i32, i32) {
    %c0_i32 = arith.constant 0 : i32
    %c0_i32_0 = arith.constant 0 : i32
    %c0_i32_1 = arith.constant 0 : i32
    return %c0_i32, %c0_i32_0 : i32, i32
  }
  func.func @transform_7(%arg0: i32) -> (i32, i32) {
    %c0_i32 = arith.constant 0 : i32
    %c0_i32_0 = arith.constant 0 : i32
    return %arg0, %c0_i32 : i32, i32
  }
}

</mosaic_0001>

<bundles_post_ra>
// kernel: tpu_custom_call.1
= control target key start
LH: loop header
LB: loop body
LE: loop exit
PB: predicated region body
PF: predicated region fallthrough
CT: control target
= control target key end

     0   :  { %s340_s28 = smov 32   ;;  %v341_v2 = vmov 0.0   ;;  %vm342_vm0 = vmmov 0   ;;  %s438_s0 = inlined_call_operand.vmem [shape: f32[2,8,8], index: 0, kind: input, shape index: {}]   ;;  %s439_s1 = inlined_call_operand.vmem [shape: f32[2,8], index: 1, kind: input, shape index: {}]   ;;  %s440_s2 = inlined_call_operand.vmem [shape: f32[2,32], index: 2, kind: input, shape index: {}]   ;;  %s441_s3 = inlined_call_operand.vmem [shape: f32[2,32], index: 3, kind: input, shape index: {}]   ;;  %s442_s4 = inlined_call_operand.vmem [shape: f32[64,8], index: 4, kind: input, shape index: {}]   ;;  %s443_s5 = inlined_call_operand.vmem [shape: f32[1,8], index: 5, kind: input, shape index: {}]   ;;  %s444_s6 = inlined_call_operand.vmem [shape: f32[1,8], index: 6, kind: input, shape index: {}]   ;;  %s445_s7 = inlined_call_operand.hbm [shape: f32[2,8], index: 7, kind: output, shape index: {}]  }
   0x1   :  { %v28_v0 = vld [vmem:[%s441_s3] sm:$0x3]  ;;  %v42_v1 = vld [vmem:[%s442_s4 + $0x38] sm:$0xff]  ;;  %281 = vmatprep.subr.mxu0 %v341_v2  ;;  %v41_v3 = vld [vmem:[%s442_s4 + $0x30] sm:$0xff]  ;;  %297 = vmatprep.mubr.msk.f32.mxu0 %vm342_vm0, %v341_v2 }
   0x2   :  { %30 = vrot.lane.b32.xlu0 %v28_v0, %s340_s28  ;;  %282 = vmatpush3.msra.mxu0 %v42_v1  ;;  %v40_v4 = vld [vmem:[%s442_s4 + $0x28] sm:$0xff] }
   0x3   :  { %283 = vmatprep.subr.mxu0 %v341_v2 }
   0x4   :  { %12 = vsyncpa [#allocation3], 0  ;;  %284 = vmatpush3.msra.mxu0 %v41_v3  ;;  %v39_v5 = vld [vmem:[%s442_s4 + $0x20] sm:$0xff]  ;;  %v38_v6 = vld [vmem:[%s442_s4 + $0x18] sm:$0xff]  ;;  %vm33_vm1 = vcmask 261120   ;;  %vm50_vm2 = vcmask 523264   ;;  %v130_v15 = vlaneseq }
   0x5   :  { %285 = vmatprep.subr.mxu0 %v341_v2  ;;  %v37_v7 = vld [vmem:[%s442_s4 + $0x10] sm:$0xff]  ;;  %v36_v8 = vld [vmem:[%s442_s4 + $0x8] sm:$0xff]  ;;  %v35_v9 = vld [vmem:[%s442_s4] sm:$0xff]  ;;  %v343_v13 = vmov 1966171168   ;;  %vm172_vm3 = vcmask 64512  }
   0x6   :  { %286 = vmatpush3.msra.mxu0 %v40_v4  ;;  %v27_v10 = vld [vmem:[%s440_s2] sm:$0x3]  ;;  %v128_v14 = vunpack.c.l.s4 %v343_v13  ;;  %v131_v17 = vshrl.u32 %v130_v15, 7  ;;  %v125_v30 = vld [vmem:[%s438_s0 + $0x8] sm:$0xff]  ;;  %v186_v47 = vand.u32 127, %v130_v15  ;;  %vm195_vm4 = vcmask 1041409  }
   0x7   :  { %287 = vmatprep.subr.mxu0 %v341_v2  ;;  %v269_v18 = vld [vmem:[%s443_s5] ss:$0 sm:$0xff]  ;;  %vm198_vm5 = vcmask 58368   ;;  %v344_v57 = vmov 0  }
   0x8   :  { %288 = vmatpush3.msra.mxu0 %v39_v5  ;;  %v129_v16 = vunpack.c.0.s8 %v128_v14  ;;  %v151_v24 = vsub.s32 0, %v131_v17  ;;  %v124_v27 = vld [vmem:[%s438_s0] sm:$0xff]  ;;  %v189_v48 = vsub.s32 %v186_v47, %v131_v17  ;;  %v210_v55 = vsub.s32 1, %v131_v17  ;;  %306 = vset.pattern.permute.xlu1 %v344_v57 }
   0x9   :  { %289 = vmatprep.subr.mxu0 %v341_v2  ;;  %v271_v34 = vld [vmem:[%s444_s6] ss:$0 sm:$0xff]  ;;  %307 = vset.pattern.permute.xlu0 %v344_v57 }
   0xa   :  { %290 = vmatpush3.msra.mxu0 %v38_v6  ;;  %v132_v19 = vsub.s32 %v129_v16, %v131_v17  ;;  %v216_v41 = vld [vmem:[%s439_s1] sm:$0x3]  ;;  %s345_s1 = smov [#allocation2]  }
   0xb   :  { %291 = vmatprep.subr.mxu0 %v341_v2  ;;  %v221_v42 = vrot.slane %v216_v41, %v151_v24  ;;  %v228_v56 = vrot.slane %v216_v41, %v210_v55  ;;  %s261_s6 = sshll.u32 %s345_s1, 4  ;;  %s262_s6 = int_to_ptr.vmem [resolvable:$true] %s261_s6 }
   0xc   :  { %292 = vmatpush3.msra.mxu0 %v37_v7  ;;  %s318_s27 = scalar_lea.vmem %s262_s6, 32  ;;  %p323_p1 = scmp.lt.s32.totalorder %s262_s6, %s262_s6 }
   0xd   :  { %293 = vmatprep.subr.mxu0 %v341_v2  ;;  %p319_p0 = scmp.ne.s32.totalorder %s262_s6, %s318_s27  ;;  %p324_p2 = scmp.lt.s32.totalorder %s318_s27, %s318_s27 }
   0xe   :  { %294 = vmatpush3.msra.mxu0 %v36_v8 }
   0xf   :  { %295 = vmatprep.subr.mxu0 %v341_v2  ;;  %p325_p3 = por %p324_p2, %p323_p1 }
  0x10   :  { %296 = vmatpush3.msra.mxu0 %v35_v9 }
  0x11   :  { %p326_p4 = pnand %p325_p3, %p319_p0 }
  0x74   :  { %v31_v11 = vpop.permute.xlu0 %30 }
  0x75   :  { %v34_v12 = vsel %vm33_vm1, %v27_v10, %v31_v11 }
  0x76   :  { %298 = vmatmul.mubr.msk.f32.vlgmr.msra.gmra.mxu0 %vm50_vm2, %v34_v12 }
 0x136   :  { %v120_v20 = vpop.f32.mrf.mxu0 }
 0x137   :  { %v121_v21 = vadd.f32 %v269_v18, %v120_v20 }
 0x138   :  { %v299_v22 = vpop.f32.mrf.mxu0 }
 0x139   :  { %v133_v23 = vrot.slane %v121_v21, %v132_v19 }
 0x13b   :  { %v134_v25 = vcombine.high %v133_v23, %v133_v23  ;;  %v141_v26 = vrot.slane %v133_v23, %v132_v19 }
 0x13d   :  { %v148_v28 = vrot.slane %v134_v25, %v132_v19  ;;  %v152_v29 = vrot.slane %v141_v26, %v151_v24 }
 0x13f   :  { %v156_v31 = vrot.slane %v148_v28, %v151_v24  ;;  %v159_v32 = vadd.f32 %v152_v29, %v124_v27 }
 0x141   :  { %v160_v33 = vadd.f32 %v156_v31, %v125_v30  ;;  %308 = vtanh.f32 %v159_v32 }
 0x143   :  { %310 = vtanh.f32 %v160_v33 }
 0x14e   :  { %v309_v35 = vpop.eup %308 }
 0x14f   :  { %v170_v36 = vmul.f32 %v309_v35, %v271_v34 }
 0x150   :  { %v311_v37 = vpop.eup %310 }
 0x151   :  { %v173_v38 = vsel %vm172_vm3, %v170_v36, 0.0  ;;  %v171_v39 = vmul.f32 %v311_v37, %v271_v34 }
 0x152   :  { %174 = vadd.xlane.f32.xlu0 %v173_v38 }
 0x153   :  { %v176_v40 = vsel %vm172_vm3, %v171_v39, 0.0 }
 0x154   :  { %177 = vadd.xlane.f32.xlu1 %v176_v40 }
 0x165   :  { %223 = vbcast.lane.b32.xlu1 %v221_v42, 256 }
 0x1db   :  { %v175_v43 = vpop.xlane.xlu0 %174 }
 0x1dc   :  { %v179_v44 = vmul.f32 1.442695, %v175_v43 }
 0x1dd   :  { %v178_v45 = vpop.xlane.xlu1 %177 }
 0x1de   :  { %312 = vpow2.f32 %v179_v44  ;;  %v181_v46 = vmul.f32 1.442695, %v178_v45 }
 0x1e0   :  { %314 = vpow2.f32 %v181_v46 }
 0x1e1   :  { %v224_v58 = vpop.permute.xlu1 %223 }
 0x1eb   :  { %v313_v49 = vpop.eup %312 }
 0x1ec   :  { %v190_v51 = vrot.slane %v313_v49, %v189_v48 }
 0x1ed   :  { %v315_v50 = vpop.eup %314 }
 0x1ee   :  { %v194_v52 = vrot.slane %v315_v50, %v189_v48 }
 0x1f0   :  { %v196_v53 = vsel %vm195_vm4, %v194_v52, %v190_v51 }
 0x1f1   :  { %v199_v54 = vsel %vm198_vm5, %v196_v53, 0.0 }
 0x1f2   :  { %200 = vadd.xlane.f32.xlu1 %v199_v54 }
 0x203   :  { %230 = vbcast.lane.b32.xlu1 %v228_v56, 256 }
 0x27b   :  { %v201_v59 = vpop.xlane.xlu1 %200 }
 0x27c   :  { %316 = vrcp.f32 %v201_v59 }
 0x27f   :  { %v231_v2 = vpop.permute.xlu1 %230 }
 0x289   :  { %v317_v60 = vpop.eup %316 }
 0x28a   :  { %v211_v61 = vrot.slane %v317_v60, %v210_v55  ;;  %v207_v62 = vrot.slane %v317_v60, %v151_v24 }
 0x28c   :  { %v214_v63 = vmul.f32 %v313_v49, %v207_v62  ;;  %v215_v0 = vmul.f32 %v315_v50, %v211_v61 }
 0x28e   :  { %v234_v1 = vmul.f32 %v224_v58, %v214_v63  ;;  %v235_v3 = vmul.f32 %v231_v2, %v215_v0 }
 0x290   :  { %239 = vperm.xlu1 %306, %v234_v1  }
 0x294   :  { %242 = vperm.xlu1 %306, %v235_v3  }
 0x30b   :  { %v240_v4 = vpop.permute.xlu1 %239 }
 0x30c   :  { %v247_v6 = vrot.slane %v240_v4, %v189_v48 }
 0x30f   :  { %v243_v5 = vpop.permute.xlu1 %242 }
 0x310   :  { %v251_v7 = vrot.slane %v243_v5, %v189_v48 }
 0x312   :  { %v252_v8 = vsel %vm195_vm4, %v251_v7, %v247_v6 }
 0x313   :  { %254 = vst.msk [vmem:[#allocation2] sm:$0x3] %vm198_vm5, %v252_v8 }
 0x314   :  { %329 = shalt.err (!%p326_p4)
}
 0x315   :  { %264 = dma.vmem_to_hbm [thread:$0]  %s262_s6, 32, %s445_s7, [#allocation3]  }
 0x316   :  { %338 = dma.done.wait [#allocation3], 32  }
 0x317   :  { %339 = vsyncadd [#allocation3], 4294967264 }
 0x318   :  { %268 = vsyncpa [#allocation3], 1 }

</bundles_post_ra>
